<compile_context>
chip_gen: v5e
topology: v5e:2x2
jax: 0.10.0
libtpu: 0.0.40
codegen_flags: <defaults>
</compile_context>

<pallas_src>
import jax
import jax.numpy as jnp
from jax.experimental import pallas as pl
from jax.experimental.pallas import tpu as pltpu

HIDDEN = 128
HEAD_PAD = 128      # fused actor-mean + critic head, lane-dense MXU weight
SUBLANE_BF16 = 16   # bf16 sublane packing


def _round_up(n, m):
    return ((n + m - 1) // m) * m


def actor_critic_kernel(x_ref, w1_ref, b1_ref, w2_ref, b2_ref, w3_ref, b3_ref,
                        wh_ref, bh_ref, mean_ref, value_ref):
    # Cast the f32 activation tile to bf16 in-VMEM (no wrapper pad/cast pass).
    x = x_ref[...].astype(jnp.bfloat16)

    # Shared MLP: 3 x (Linear + ReLU). bf16 MXU operands, f32 accumulation,
    # bias add + ReLU in f32.
    h = jnp.dot(x, w1_ref[...], preferred_element_type=jnp.float32) + b1_ref[...]
    h = jnp.maximum(h, 0.0).astype(jnp.bfloat16)
    h = jnp.dot(h, w2_ref[...], preferred_element_type=jnp.float32) + b2_ref[...]
    h = jnp.maximum(h, 0.0).astype(jnp.bfloat16)
    h = jnp.dot(h, w3_ref[...], preferred_element_type=jnp.float32) + b3_ref[...]
    h = jnp.maximum(h, 0.0).astype(jnp.bfloat16)

    # Fused heads: one [128, 128] MXU matmul, then split the in-register f32
    # result into the two narrow outputs (mean cols [0:A), value col A).
    head = jnp.dot(h, wh_ref[...], preferred_element_type=jnp.float32) + bh_ref[...]
    A = mean_ref.shape[-1]
    mean_ref[...] = head[:, :A]
    value_ref[...] = head[:, A:A + 1]


def actor_critic_forward(x, params, *, block_b=2048):
    """x: [B, state_dim] float32.
    Returns (action_mean [B, A] f32, action_std [A] f32, value [B, 1] f32)."""
    B, state_dim = x.shape
    A = int(params["action_dim"])

    # Batch tile: big blocks to amortize the ~0.35 us per-grid-step overhead,
    # rounded to the bf16 sublane multiple (16), and capped at ceil(B/2) so the
    # grid has >= 2 programs whenever B allows it (v7x dual TensorCore).
    bb = min(block_b, _round_up(max((B + 1) // 2, 1), SUBLANE_BF16))
    b_pad = _round_up(B, bb)
    if b_pad > B:
        x = jnp.pad(x, ((0, b_pad - B), (0, 0)))
    grid = (b_pad // bb,)

    w_args = (params["w1"], params["b1"], params["w2"], params["b2"],
              params["w3"], params["b3"], params["w_head"], params["b_head"])

    mean_pad, value_pad = pl.pallas_call(
        actor_critic_kernel,
        out_shape=(jax.ShapeDtypeStruct((b_pad, A), jnp.float32),
                   jax.ShapeDtypeStruct((b_pad, 1), jnp.float32)),
        grid=grid,
        in_specs=[pl.BlockSpec((bb, state_dim), lambda i: (i, 0))]
                 # Full-shape blocks, constant index map -> weights stay
                 # VMEM-resident across the batch grid.
                 + [pl.BlockSpec(a.shape, lambda i: (0, 0)) for a in w_args],
        out_specs=(pl.BlockSpec((bb, A), lambda i: (i, 0)),
                   pl.BlockSpec((bb, 1), lambda i: (i, 0))),
        compiler_params=pltpu.CompilerParams(
            dimension_semantics=("parallel",)),
    )(x, *w_args)

    mean = mean_pad if b_pad == B else mean_pad[:B]
    value = value_pad if b_pad == B else value_pad[:B]
    std = jnp.exp(params["log_std"])  # state-independent parameter transform
    return mean, std, value


def init_params(key, state_dim, action_dim, hidden=HIDDEN):
    """Mimics nn.Linear default init (uniform +-1/sqrt(fan_in)).
    Weights stored [in, out] (transposed vs PyTorch), bf16 for the MXU.
    The actor-mean and critic heads are fused into one [hidden, 128] weight:
    cols [0:action_dim) = mean head, col action_dim = critic head."""
    assert action_dim + 1 <= HEAD_PAD, (
        f"fused head supports action_dim <= {HEAD_PAD - 1}, got {action_dim}")

    def linear(k, fan_in, fan_out):
        kw, kb = jax.random.split(k)
        bound = 1.0 / jnp.sqrt(jnp.float32(fan_in))
        w = jax.random.uniform(kw, (fan_in, fan_out), jnp.float32, -bound, bound)
        b = jax.random.uniform(kb, (fan_out,), jnp.float32, -bound, bound)
        return w, b

    k1, k2, k3, k4, k5 = jax.random.split(key, 5)
    w1, b1 = linear(k1, state_dim, hidden)
    w2, b2 = linear(k2, hidden, hidden)
    w3, b3 = linear(k3, hidden, hidden)
    wm, bm = linear(k4, hidden, action_dim)
    wc, bc = linear(k5, hidden, 1)

    w_head = (jnp.zeros((hidden, HEAD_PAD), jnp.float32)
              .at[:, :action_dim].set(wm)
              .at[:, action_dim].set(wc[:, 0]))
    b_head = (jnp.zeros((HEAD_PAD,), jnp.float32)
              .at[:action_dim].set(bm)
              .at[action_dim].set(bc[0]))

    return dict(
        action_dim=action_dim,
        w1=w1.astype(jnp.bfloat16), b1=b1.reshape(1, hidden),
        w2=w2.astype(jnp.bfloat16), b2=b2.reshape(1, hidden),
        w3=w3.astype(jnp.bfloat16), b3=b3.reshape(1, hidden),
        w_head=w_head.astype(jnp.bfloat16), b_head=b_head.reshape(1, HEAD_PAD),
        log_std=jnp.zeros((action_dim,), jnp.float32) - 0.5,
    )


def reference_forward(x, params):
    """Same math in plain JAX (bf16 operands, f32 accumulation) for validation."""
    A = int(params["action_dim"])
    h = x.astype(jnp.bfloat16)

    def layer(h, w, b):
        y = jnp.dot(h, w, preferred_element_type=jnp.float32) + b
        return jnp.maximum(y, 0.0).astype(jnp.bfloat16)

    h = layer(h, params["w1"], params["b1"])
    h = layer(h, params["w2"], params["b2"])
    h = layer(h, params["w3"], params["b3"])
    head = (jnp.dot(h, params["w_head"], preferred_element_type=jnp.float32)
            + params["b_head"])
    return head[:, :A], jnp.exp(params["log_std"]), head[:, A:A + 1]


if __name__ == "__main__":
    key = jax.random.PRNGKey(0)
    k_param, k_x = jax.random.split(key)

    B, STATE_DIM, ACTION_DIM = 8, 16, 4
    params = init_params(k_param, STATE_DIM, ACTION_DIM)
    x = jax.random.normal(k_x, (B, STATE_DIM), jnp.float32)

    mean, std, value = jax.block_until_ready(actor_critic_forward(x, params))

    # sanity check against a plain-JAX reference with identical numerics
    r_mean, r_std, r_value = reference_forward(x, params)
    assert mean.shape == (B, ACTION_DIM)
    assert std.shape == (ACTION_DIM,)
    assert value.shape == (B, 1)
    assert jnp.allclose(mean, r_mean, atol=1e-3, rtol=1e-3)
    assert jnp.allclose(std, r_std, atol=1e-6)
    assert jnp.allclose(value, r_value, atol=1e-3, rtol=1e-3)

    print("KERNEL_OK")
</pallas_src>

<mosaic_0001>
module attributes {stable_mosaic.version = 11 : i64} {
  func.func @actor_critic_kernel(%arg0: i32, %arg1: memref<16x16xf32, #tpu.memory_space<vmem>>, %arg2: memref<16x128xbf16, #tpu.memory_space<vmem>>, %arg3: memref<1x128xf32, #tpu.memory_space<vmem>>, %arg4: memref<128x128xbf16, #tpu.memory_space<vmem>>, %arg5: memref<1x128xf32, #tpu.memory_space<vmem>>, %arg6: memref<128x128xbf16, #tpu.memory_space<vmem>>, %arg7: memref<1x128xf32, #tpu.memory_space<vmem>>, %arg8: memref<128x128xbf16, #tpu.memory_space<vmem>>, %arg9: memref<1x128xf32, #tpu.memory_space<vmem>>, %arg10: memref<16x4xf32, #tpu.memory_space<vmem>>, %arg11: memref<16x1xf32, #tpu.memory_space<vmem>>) attributes {dimension_semantics = [#tpu.dimension_semantics<parallel>], iteration_bounds = array<i64: 1>, scalar_prefetch = 0 : i64, scratch_operands = 0 : i64, tpu.core_type = #tpu.core_type<tc>, window_params = [{transform_indices = @transform_0, window_bounds = array<i64: 16, 16>}, {pipeline_mode = #tpu.pipeline_mode<synchronous>, transform_indices = @transform_1, window_bounds = array<i64: 16, 128>}, {pipeline_mode = #tpu.pipeline_mode<synchronous>, transform_indices = @transform_2, window_bounds = array<i64: 1, 128>}, {pipeline_mode = #tpu.pipeline_mode<synchronous>, transform_indices = @transform_3, window_bounds = array<i64: 128, 128>}, {pipeline_mode = #tpu.pipeline_mode<synchronous>, transform_indices = @transform_4, window_bounds = array<i64: 1, 128>}, {pipeline_mode = #tpu.pipeline_mode<synchronous>, transform_indices = @transform_5, window_bounds = array<i64: 128, 128>}, {pipeline_mode = #tpu.pipeline_mode<synchronous>, transform_indices = @transform_6, window_bounds = array<i64: 1, 128>}, {pipeline_mode = #tpu.pipeline_mode<synchronous>, transform_indices = @transform_7, window_bounds = array<i64: 128, 128>}, {pipeline_mode = #tpu.pipeline_mode<synchronous>, transform_indices = @transform_8, window_bounds = array<i64: 1, 128>}, {transform_indices = @transform_9, window_bounds = array<i64: 16, 4>}, {transform_indices = @transform_10, window_bounds = array<i64: 16, 1>}]} {
    %c0 = arith.constant 0 : index
    %c0_0 = arith.constant 0 : index
    %0 = vector.load %arg1[%c0, %c0_0] : memref<16x16xf32, #tpu.memory_space<vmem>>, vector<16x16xf32>
    %1 = arith.truncf %0 : vector<16x16xf32> to vector<16x16xbf16>
    %c0_1 = arith.constant 0 : index
    %c0_2 = arith.constant 0 : index
    %2 = vector.load %arg2[%c0_1, %c0_2] : memref<16x128xbf16, #tpu.memory_space<vmem>>, vector<16x128xbf16>
    %cst = arith.constant dense<0.000000e+00> : vector<16x128xf32>
    %3 = tpu.matmul %1, %2, %cst {dimension_numbers = #tpu.dot_dimension_numbers<[1], [0], [0], [1], [0, 0, 1, 1], [], []>} : vector<16x16xbf16>, vector<16x128xbf16>, vector<16x128xf32> -> vector<16x128xf32>
    %c0_3 = arith.constant 0 : index
    %c0_4 = arith.constant 0 : index
    %4 = vector.load %arg3[%c0_3, %c0_4] : memref<1x128xf32, #tpu.memory_space<vmem>>, vector<1x128xf32>
    %5 = vector.broadcast %4 : vector<1x128xf32> to vector<16x128xf32>
    %6 = arith.addf %3, %5 : vector<16x128xf32>
    %cst_5 = arith.constant 0.000000e+00 : f32
    %7 = vector.broadcast %cst_5 : f32 to vector<16x128xf32>
    %8 = arith.maximumf %6, %7 : vector<16x128xf32>
    %9 = arith.truncf %8 : vector<16x128xf32> to vector<16x128xbf16>
    %c0_6 = arith.constant 0 : index
    %c0_7 = arith.constant 0 : index
    %10 = vector.load %arg4[%c0_6, %c0_7] : memref<128x128xbf16, #tpu.memory_space<vmem>>, vector<128x128xbf16>
    %cst_8 = arith.constant dense<0.000000e+00> : vector<16x128xf32>
    %11 = tpu.matmul %9, %10, %cst_8 {dimension_numbers = #tpu.dot_dimension_numbers<[1], [0], [0], [1], [0, 0, 1, 1], [], []>} : vector<16x128xbf16>, vector<128x128xbf16>, vector<16x128xf32> -> vector<16x128xf32>
    %c0_9 = arith.constant 0 : index
    %c0_10 = arith.constant 0 : index
    %12 = vector.load %arg5[%c0_9, %c0_10] : memref<1x128xf32, #tpu.memory_space<vmem>>, vector<1x128xf32>
    %13 = vector.broadcast %12 : vector<1x128xf32> to vector<16x128xf32>
    %14 = arith.addf %11, %13 : vector<16x128xf32>
    %cst_11 = arith.constant 0.000000e+00 : f32
    %15 = vector.broadcast %cst_11 : f32 to vector<16x128xf32>
    %16 = arith.maximumf %14, %15 : vector<16x128xf32>
    %17 = arith.truncf %16 : vector<16x128xf32> to vector<16x128xbf16>
    %c0_12 = arith.constant 0 : index
    %c0_13 = arith.constant 0 : index
    %18 = vector.load %arg6[%c0_12, %c0_13] : memref<128x128xbf16, #tpu.memory_space<vmem>>, vector<128x128xbf16>
    %cst_14 = arith.constant dense<0.000000e+00> : vector<16x128xf32>
    %19 = tpu.matmul %17, %18, %cst_14 {dimension_numbers = #tpu.dot_dimension_numbers<[1], [0], [0], [1], [0, 0, 1, 1], [], []>} : vector<16x128xbf16>, vector<128x128xbf16>, vector<16x128xf32> -> vector<16x128xf32>
    %c0_15 = arith.constant 0 : index
    %c0_16 = arith.constant 0 : index
    %20 = vector.load %arg7[%c0_15, %c0_16] : memref<1x128xf32, #tpu.memory_space<vmem>>, vector<1x128xf32>
    %21 = vector.broadcast %20 : vector<1x128xf32> to vector<16x128xf32>
    %22 = arith.addf %19, %21 : vector<16x128xf32>
    %cst_17 = arith.constant 0.000000e+00 : f32
    %23 = vector.broadcast %cst_17 : f32 to vector<16x128xf32>
    %24 = arith.maximumf %22, %23 : vector<16x128xf32>
    %25 = arith.truncf %24 : vector<16x128xf32> to vector<16x128xbf16>
    %c0_18 = arith.constant 0 : index
    %c0_19 = arith.constant 0 : index
    %26 = vector.load %arg8[%c0_18, %c0_19] : memref<128x128xbf16, #tpu.memory_space<vmem>>, vector<128x128xbf16>
    %cst_20 = arith.constant dense<0.000000e+00> : vector<16x128xf32>
    %27 = tpu.matmul %25, %26, %cst_20 {dimension_numbers = #tpu.dot_dimension_numbers<[1], [0], [0], [1], [0, 0, 1, 1], [], []>} : vector<16x128xbf16>, vector<128x128xbf16>, vector<16x128xf32> -> vector<16x128xf32>
    %c0_21 = arith.constant 0 : index
    %c0_22 = arith.constant 0 : index
    %28 = vector.load %arg9[%c0_21, %c0_22] : memref<1x128xf32, #tpu.memory_space<vmem>>, vector<1x128xf32>
    %29 = vector.broadcast %28 : vector<1x128xf32> to vector<16x128xf32>
    %30 = arith.addf %27, %29 : vector<16x128xf32>
    %31 = vector.extract_strided_slice %30 {offsets = [0, 0], sizes = [16, 4], strides = [1, 1]} : vector<16x128xf32> to vector<16x4xf32>
    %c0_23 = arith.constant 0 : index
    %c0_24 = arith.constant 0 : index
    %32 = vector.load %arg10[%c0_23, %c0_24] : memref<16x4xf32, #tpu.memory_space<vmem>>, vector<16x4xf32>
    tpu.vector_store %arg10[%c0_23, %c0_24], %31 {strides = array<i32>} : memref<16x4xf32, #tpu.memory_space<vmem>>, vector<16x4xf32>,
    %33 = vector.extract_strided_slice %30 {offsets = [0, 4], sizes = [16, 1], strides = [1, 1]} : vector<16x128xf32> to vector<16x1xf32>
    %c0_25 = arith.constant 0 : index
    %c0_26 = arith.constant 0 : index
    %34 = vector.load %arg11[%c0_25, %c0_26] : memref<16x1xf32, #tpu.memory_space<vmem>>, vector<16x1xf32>
    tpu.vector_store %arg11[%c0_25, %c0_26], %33 {strides = array<i32>} : memref<16x1xf32, #tpu.memory_space<vmem>>, vector<16x1xf32>,
    return
  }
  func.func @transform_0(%arg0: i32) -> (i32, i32) {
    %c0_i32 = arith.constant 0 : i32
    %c0_i32_0 = arith.constant 0 : i32
    return %arg0, %c0_i32 : i32, i32
  }
  func.func @transform_1(%arg0: i32) -> (i32, i32) {
    %c0_i32 = arith.constant 0 : i32
    %c0_i32_0 = arith.constant 0 : i32
    %c0_i32_1 = arith.constant 0 : i32
    return %c0_i32, %c0_i32_0 : i32, i32
  }
  func.func @transform_2(%arg0: i32) -> (i32, i32) {
    %c0_i32 = arith.constant 0 : i32
    %c0_i32_0 = arith.constant 0 : i32
    %c0_i32_1 = arith.constant 0 : i32
    return %c0_i32, %c0_i32_0 : i32, i32
  }
  func.func @transform_3(%arg0: i32) -> (i32, i32) {
    %c0_i32 = arith.constant 0 : i32
    %c0_i32_0 = arith.constant 0 : i32
    %c0_i32_1 = arith.constant 0 : i32
    return %c0_i32, %c0_i32_0 : i32, i32
  }
  func.func @transform_4(%arg0: i32) -> (i32, i32) {
    %c0_i32 = arith.constant 0 : i32
    %c0_i32_0 = arith.constant 0 : i32
    %c0_i32_1 = arith.constant 0 : i32
    return %c0_i32, %c0_i32_0 : i32, i32
  }
  func.func @transform_5(%arg0: i32) -> (i32, i32) {
    %c0_i32 = arith.constant 0 : i32
    %c0_i32_0 = arith.constant 0 : i32
    %c0_i32_1 = arith.constant 0 : i32
    return %c0_i32, %c0_i32_0 : i32, i32
  }
  func.func @transform_6(%arg0: i32) -> (i32, i32) {
    %c0_i32 = arith.constant 0 : i32
    %c0_i32_0 = arith.constant 0 : i32
    %c0_i32_1 = arith.constant 0 : i32
    return %c0_i32, %c0_i32_0 : i32, i32
  }
  func.func @transform_7(%arg0: i32) -> (i32, i32) {
    %c0_i32 = arith.constant 0 : i32
    %c0_i32_0 = arith.constant 0 : i32
    %c0_i32_1 = arith.constant 0 : i32
    return %c0_i32, %c0_i32_0 : i32, i32
  }
  func.func @transform_8(%arg0: i32) -> (i32, i32) {
    %c0_i32 = arith.constant 0 : i32
    %c0_i32_0 = arith.constant 0 : i32
    %c0_i32_1 = arith.constant 0 : i32
    return %c0_i32, %c0_i32_0 : i32, i32
  }
  func.func @transform_9(%arg0: i32) -> (i32, i32) {
    %c0_i32 = arith.constant 0 : i32
    %c0_i32_0 = arith.constant 0 : i32
    return %arg0, %c0_i32 : i32, i32
  }
  func.func @transform_10(%arg0: i32) -> (i32, i32) {
    %c0_i32 = arith.constant 0 : i32
    %c0_i32_0 = arith.constant 0 : i32
    return %arg0, %c0_i32 : i32, i32
  }
}

</mosaic_0001>

<bundles_post_ra>
// kernel: tpu_custom_call.1
= control target key start
LH: loop header
LB: loop body
LE: loop exit
PB: predicated region body
PF: predicated region fallthrough
CT: control target
= control target key end

     0   :  { %16 = vsyncpa [#allocation3], 0  ;;  %s808_s0 = inlined_call_operand.hbm [shape: f32[16,16], index: 0, kind: input, shape index: {}]   ;;  %s809_s1 = inlined_call_operand.hbm [shape: bf16[16,128], index: 1, kind: input, shape index: {}]   ;;  %s810_s2 = inlined_call_operand.vmem [shape: f32[1,128], index: 2, kind: input, shape index: {}]   ;;  %s811_s3 = inlined_call_operand.hbm [shape: bf16[128,128], index: 3, kind: input, shape index: {}]   ;;  %s812_s4 = inlined_call_operand.vmem [shape: f32[1,128], index: 4, kind: input, shape index: {}]   ;;  %s813_s5 = inlined_call_operand.hbm [shape: bf16[128,128], index: 5, kind: input, shape index: {}]   ;;  %s814_s6 = inlined_call_operand.vmem [shape: f32[1,128], index: 6, kind: input, shape index: {}]   ;;  %s815_s7 = inlined_call_operand.hbm [shape: bf16[128,128], index: 7, kind: input, shape index: {}]   ;;  %s816_s8 = inlined_call_operand.vmem [shape: f32[1,128], index: 8, kind: input, shape index: {}]   ;;  %s817_s9 = inlined_call_operand.vmem [shape: f32[16,4], index: 9, kind: output, shape index: {0}]   ;;  %s818_s10 = inlined_call_operand.vmem [shape: f32[16,1], index: 10, kind: output, shape index: {1}]  }
   0x1   :  { %17 = vsyncpa [#allocation5], 0  ;;  %s36_s15 = sshll.u32 %s809_s1, 4  ;;  %s37_s15 = int_to_ptr.hbm [resolvable:$true] %s36_s15 }
   0x2   :  { %18 = vsyncpa [#allocation8], 0  ;;  %s692_s16 = smov [#allocation4]   ;;  %s66_s20 = sshll.u32 %s813_s5, 4  ;;  %s67_s20 = int_to_ptr.hbm [resolvable:$true] %s66_s20 }
   0x3   :  { %s38_s17 = sshll.u32 %s692_s16, 4  ;;  %s693_s21 = smov 64   ;;  %s39_s17 = int_to_ptr.vmem [resolvable:$true] %s38_s17 }
   0x4   :  { %s694_s22 = smov 4   ;;  %s695_s23 = smov [#allocation7]  }
   0x5   :  { %44 = dma.hbm_to_vmem [thread:$0]  %s37_s15, 128, %s39_s17, [#allocation5], %s693_s21, %s693_s21, %s694_s22  }
   0x6   :  { %s68_s24 = sshll.u32 %s695_s23, 4  ;;  %s23_s26 = sshll.u32 %s808_s0, 4  ;;  %s69_s24 = int_to_ptr.vmem [resolvable:$true] %s68_s24  ;;  %s24_s26 = int_to_ptr.hbm [resolvable:$true] %s23_s26 }
   0x7   :  { %74 = dma.hbm_to_vmem [thread:$0]  %s67_s20, 1024, %s69_s24, [#allocation8], %s693_s21, %s693_s21, %s694_s22  }
   0x8   :  { %s696_s5 = smov [#allocation2]   ;;  %s51_s30 = sshll.u32 %s811_s3, 4  ;;  %s52_s30 = int_to_ptr.hbm [resolvable:$true] %s51_s30 }
   0x9   :  { %s25_s27 = sshll.u32 %s696_s5, 4  ;;  %s697_s11 = smov 128   ;;  %s26_s27 = int_to_ptr.vmem [resolvable:$true] %s25_s27 }
   0xa   :  { %s698_s12 = smov 8   ;;  %s699_s13 = smov [#allocation6]  }
   0xb   :  { %31 = dma.hbm_to_vmem [thread:$0]  %s24_s26, 256, %s26_s27, [#allocation3], %s697_s11, %s697_s11, %s698_s12  }
   0xc   :  { %s53_s14 = sshll.u32 %s699_s13, 4  ;;  %s81_s16 = sshll.u32 %s815_s7, 4  ;;  %s54_s14 = int_to_ptr.vmem [resolvable:$true] %s53_s14  ;;  %s82_s16 = int_to_ptr.hbm [resolvable:$true] %s81_s16 }
   0xd   :  { %59 = dma.hbm_to_vmem [thread:$0]  %s52_s30, 1024, %s54_s14, [#allocation5], %s693_s21, %s693_s21, %s694_s22  }
   0xe   :  { %s700_s17 = smov [#allocation9]  }
   0xf   :  { %s83_s18 = sshll.u32 %s700_s17, 4  ;;  %s84_s18 = int_to_ptr.vmem [resolvable:$true] %s83_s18 }
  0x10   :  { %89 = dma.hbm_to_vmem [thread:$0]  %s82_s16, 1024, %s84_s18, [#allocation8], %s693_s21, %s693_s21, %s694_s22  }
  0x11   :  { %686 = dma.done.wait [#allocation3], 256  }
  0x12   :  { %687 = vsyncadd [#allocation3], 4294967040 }
  0x13   :  { %688 = dma.done.wait [#allocation5], 1152  }
  0x14   :  { %689 = vsyncadd [#allocation5], 4294966144 }
  0x15   :  { %690 = dma.done.wait [#allocation8], 2048  }
  0x16   :  { %691 = vsyncadd [#allocation8], 4294965248  ;;  %v527_v0 = vld [vmem:[#allocation4] sm:$0xff]  ;;  %v113_v1 = vld [vmem:[#allocation2] sm:$0xff]  ;;  %vm128_vm0 = vcmask 130048   ;;  %vm401_vm1 = vcmask 31744  }
  0x17   :  { %v114_v2 = vld [vmem:[#allocation2 + $0x8] sm:$0xff]  ;;  %v535_v4 = vld [vmem:[#allocation6 + $0x38] sm:$0xff]  ;;  %139 = vmatpush.bf16.msra.mxu0 %v527_v0  ;;  %v533_v6 = vld [vmem:[#allocation6 + $0x28] sm:$0xff]  ;;  %s701_s25 = smov 124   ;;  %vm412_vm2 = vcmask 7168  }
  0x18   :  { %v115_v3 = vpack.c.bf16 %v114_v2, %v113_v1  ;;  %v534_v5 = vld [vmem:[#allocation6 + $0x30] sm:$0xff]  ;;  %217 = vmatpush.bf16.msra.mxu1 %v535_v4  ;;  %v532_v7 = vld [vmem:[#allocation6 + $0x20] sm:$0xff]  ;;  %v531_v8 = vld [vmem:[#allocation6 + $0x18] sm:$0xff] }
  0x19   :  { %v530_v9 = vld [vmem:[#allocation6 + $0x10] sm:$0xff]  ;;  %v529_v10 = vld [vmem:[#allocation6 + $0x8] sm:$0xff]  ;;  %v528_v11 = vld [vmem:[#allocation6] sm:$0xff] }
  0x1a   :  { %430 = vmatmul.msk.bf16.vlgmr.msra.gmra.mxu0 %vm128_vm0, %v115_v3  ;;  %v543_v12 = vld [vmem:[#allocation7 + $0x38] sm:$0xff]  ;;  %v542_v13 = vld [vmem:[#allocation7 + $0x30] sm:$0xff]  ;;  %v541_v14 = vld [vmem:[#allocation7 + $0x28] sm:$0xff] }
  0x1b   :  { %302 = vmatpush.bf16.msra.mxu2 %v543_v12  ;;  %v540_v15 = vld [vmem:[#allocation7 + $0x20] sm:$0xff]  ;;  %v562_v17 = vld [vmem:[%s810_s2] ss:$0 sm:$0xff]  ;;  %v539_v24 = vld [vmem:[#allocation7 + $0x18] sm:$0xff] }
  0x1c   :  { %218 = vmatpush.bf16.msra.mxu1 %v534_v5  ;;  %v538_v25 = vld [vmem:[#allocation7 + $0x10] sm:$0xff]  ;;  %v537_v26 = vld [vmem:[#allocation7 + $0x8] sm:$0xff]  ;;  %v536_v27 = vld [vmem:[#allocation7] sm:$0xff] }
  0x1d   :  { %v551_v28 = vld [vmem:[#allocation9 + $0x38] sm:$0xff]  ;;  %v550_v29 = vld [vmem:[#allocation9 + $0x30] sm:$0xff]  ;;  %v549_v30 = vld [vmem:[#allocation9 + $0x28] sm:$0xff] }
  0x1e   :  { %387 = vmatpush.bf16.msra.mxu3 %v551_v28  ;;  %v548_v31 = vld [vmem:[#allocation9 + $0x20] sm:$0xff]  ;;  %v563_v33 = vld [vmem:[%s812_s4] ss:$0 sm:$0xff]  ;;  %v547_v40 = vld [vmem:[#allocation9 + $0x18] sm:$0xff] }
  0x1f   :  { %303 = vmatpush.bf16.msra.mxu2 %v542_v13  ;;  %v546_v41 = vld [vmem:[#allocation9 + $0x10] sm:$0xff]  ;;  %v545_v42 = vld [vmem:[#allocation9 + $0x8] sm:$0xff]  ;;  %v544_v43 = vld [vmem:[#allocation9] sm:$0xff] }
  0x20   :  { %219 = vmatpush.bf16.msra.mxu1 %v533_v6  ;;  %v564_v45 = vld [vmem:[%s814_s6] ss:$0 sm:$0xff] }
  0x21   :  { %v565_v52 = vld [vmem:[%s816_s8] ss:$0 sm:$0xff] }
  0x22   :  { %388 = vmatpush.bf16.msra.mxu3 %v550_v29 }
  0x23   :  { %304 = vmatpush.bf16.msra.mxu2 %v541_v14 }
  0x24   :  { %220 = vmatpush.bf16.msra.mxu1 %v532_v7 }
  0x26   :  { %389 = vmatpush.bf16.msra.mxu3 %v549_v30 }
  0x27   :  { %305 = vmatpush.bf16.msra.mxu2 %v540_v15 }
  0x28   :  { %221 = vmatpush.bf16.msra.mxu1 %v531_v8 }
  0x2a   :  { %390 = vmatpush.bf16.msra.mxu3 %v548_v31 }
  0x2b   :  { %306 = vmatpush.bf16.msra.mxu2 %v539_v24 }
  0x2c   :  { %222 = vmatpush.bf16.msra.mxu1 %v530_v9 }
  0x2e   :  { %391 = vmatpush.bf16.msra.mxu3 %v547_v40 }
  0x2f   :  { %307 = vmatpush.bf16.msra.mxu2 %v538_v25 }
  0x30   :  { %223 = vmatpush.bf16.msra.mxu1 %v529_v10 }
  0x32   :  { %392 = vmatpush.bf16.msra.mxu3 %v546_v41 }
  0x33   :  { %308 = vmatpush.bf16.msra.mxu2 %v537_v26 }
  0x34   :  { %224 = vmatpush.bf16.msra.mxu1 %v528_v11 }
  0x36   :  { %393 = vmatpush.bf16.msra.mxu3 %v545_v42 }
  0x37   :  { %309 = vmatpush.bf16.msra.mxu2 %v536_v27 }
  0x3a   :  { %394 = vmatpush.bf16.msra.mxu3 %v544_v43 }
  0x97   :  { %v141_v16 = vpop.f32.mrf.mxu0 }
  0x98   :  { %v142_v18 = vadd.f32 %v562_v17, %v141_v16 }
  0x9a   :  { %v146_v21 = vmax.f32 %v142_v18, 0.0 }
  0x9f   :  { %v143_v19 = vpop.f32.mrf.mxu0 }
  0xa0   :  { %v144_v20 = vadd.f32 %v562_v17, %v143_v19 }
  0xa2   :  { %v147_v22 = vmax.f32 %v144_v20, 0.0 }
  0xa4   :  { %v148_v23 = vpack.c.bf16 %v147_v22, %v146_v21 }
  0xa6   :  { %225 = vmatmul.bf16.vlgmr.msra.gmra.mxu1 %v148_v23 }
 0x123   :  { %v226_v32 = vpop.f32.mrf.mxu1 }
 0x124   :  { %v227_v34 = vadd.f32 %v563_v33, %v226_v32 }
 0x126   :  { %v231_v37 = vmax.f32 %v227_v34, 0.0 }
 0x12b   :  { %v228_v35 = vpop.f32.mrf.mxu1 }
 0x12c   :  { %v229_v36 = vadd.f32 %v563_v33, %v228_v35 }
 0x12e   :  { %v232_v38 = vmax.f32 %v229_v36, 0.0 }
 0x130   :  { %v233_v39 = vpack.c.bf16 %v232_v38, %v231_v37 }
 0x132   :  { %310 = vmatmul.bf16.vlgmr.msra.gmra.mxu2 %v233_v39 }
 0x1b5   :  { %v311_v44 = vpop.f32.mrf.mxu2 }
 0x1b6   :  { %v312_v46 = vadd.f32 %v564_v45, %v311_v44 }
 0x1b8   :  { %v316_v49 = vmax.f32 %v312_v46, 0.0 }
 0x1bd   :  { %v313_v47 = vpop.f32.mrf.mxu2 }
 0x1be   :  { %v314_v48 = vadd.f32 %v564_v45, %v313_v47 }
 0x1c0   :  { %v317_v50 = vmax.f32 %v314_v48, 0.0 }
 0x1c2   :  { %v318_v51 = vpack.c.bf16 %v317_v50, %v316_v49 }
 0x1c4   :  { %395 = vmatmul.bf16.vlgmr.msra.gmra.mxu3 %v318_v51 }
 0x247   :  { %v396_v53 = vpop.f32.mrf.mxu3 }
 0x248   :  { %v397_v54 = vadd.f32 %v565_v52, %v396_v53 }
 0x24a   :  { %402 = vst.msk [vmem:[%s817_s9] sm:$0xff] %vm401_vm1, %v397_v54  ;;  %406 = vrot.lane.b32.xlu0 %v397_v54, %s701_s25 }
 0x24f   :  { %v398_v55 = vpop.f32.mrf.mxu3 }
 0x250   :  { %v399_v56 = vadd.f32 %v565_v52, %v398_v55 }
 0x252   :  { %403 = vst.msk [vmem:[%s817_s9 + $0x8] sm:$0xff] %vm401_vm1, %v399_v56  ;;  %408 = vrot.lane.b32.xlu0 %v399_v56, %s701_s25 }
 0x2bc   :  { %v407_v57 = vpop.permute.xlu0 %406 }
 0x2bd   :  { %413 = vst.msk [vmem:[%s818_s10] sm:$0xff] %vm412_vm2, %v407_v57 }
 0x2c4   :  { %v409_v58 = vpop.permute.xlu0 %408 }
 0x2c5   :  { %414 = vst.msk [vmem:[%s818_s10 + $0x8] sm:$0xff] %vm412_vm2, %v409_v58 }
 0x2c6   :  { %423 = vsyncpa [#allocation3], 1 }
 0x2c7   :  { %424 = vsyncpa [#allocation5], 1 }
 0x2c8   :  { %425 = vsyncpa [#allocation8], 1 }

</bundles_post_ra>
